<compile_context>
chip_gen: v7x
topology: tpu7x:2x2x1
jax: 0.10.0
libtpu: 0.0.40
codegen_flags: <defaults>
</compile_context>

<pallas_src>
import functools

import jax
import jax.numpy as jnp
import numpy as np
from jax.experimental import pallas as pl
from jax.experimental.pallas import tpu as pltpu


def _gcn_resident_h_kernel(h_ref, adj_ref, o_ref, acc_ref, *, tk):
    """adj tile (TM, TK) x VMEM-resident h (N_k, Dout_p), f32 accumulation."""
    k = pl.program_id(1)

    @pl.when(k == 0)
    def _():
        acc_ref[...] = jnp.zeros_like(acc_ref)

    start = pl.multiple_of(k * tk, 128)
    acc_ref[...] += jnp.dot(
        adj_ref[...], h_ref[pl.ds(start, tk), :],
        preferred_element_type=jnp.float32,
    )

    @pl.when(k == pl.num_programs(1) - 1)
    def _():
        o_ref[...] = jnp.maximum(acc_ref[...], 0.0).astype(o_ref.dtype)


def _gcn_streamed_h_kernel(h_ref, adj_ref, o_ref, acc_ref):
    """Fallback: h streamed as (TK, Dout_p) tiles (for very large N)."""
    k = pl.program_id(1)

    @pl.when(k == 0)
    def _():
        acc_ref[...] = jnp.zeros_like(acc_ref)

    acc_ref[...] += jnp.dot(
        adj_ref[...], h_ref[...], preferred_element_type=jnp.float32
    )

    @pl.when(k == pl.num_programs(1) - 1)
    def _():
        o_ref[...] = jnp.maximum(acc_ref[...], 0.0).astype(o_ref.dtype)


def _round_up(v, m):
    return (v + m - 1) // m * m


def _vmem_capacity_bytes():
    # v5e/v6e: 128 MiB, v7x: 64 MiB per TensorCore.  Conservative fallback.
    try:
        return int(pltpu.get_tpu_info().vmem_capacity_bytes)
    except Exception:
        return 64 << 20


def graph_conv_sparse(x, adj, weight, *, tm=1024, tk=2048,
                      compute_dtype=jnp.bfloat16, out_dtype=jnp.float32,
                      h_resident=None):
    """Forward pass of GraphConvSparse: relu(adj @ (x @ W))."""
    n, din = x.shape
    din_w, dout = weight.shape
    assert adj.shape == (n, n)
    assert din_w == din

    itemsize = jnp.dtype(compute_dtype).itemsize
    out_itemsize = jnp.dtype(out_dtype).itemsize

    n128 = _round_up(n, 128)
    dout_p = _round_up(dout, 128)          # lane-dense output, full MXU cols

    # Clamp tiles to the problem (multiples of 128); keep >= 2 row tiles so
    # the "parallel" axis shards across both TensorCores on v7x.
    tm = max(128, min(tm, n128) // 128 * 128)
    tk = max(128, min(tk, n128) // 128 * 128)
    if n128 >= 256:
        tm = min(tm, max(128, (n128 // 2) // 128 * 128))

    cap = _vmem_capacity_bytes()
    budget = cap // 2                      # headroom for compiler internals

    if h_resident is None:                 # resident h only if comfortably small
        h_resident = 2 * _round_up(n, tk) * dout_p * itemsize <= budget // 3

    def est(tm_, tk_):
        nk = _round_up(n, tk_)
        h_bytes = 2 * (nk if h_resident else tk_) * dout_p * itemsize
        return (2 * tm_ * tk_ * itemsize           # double-buffered adj tiles
                + 2 * tm_ * dout_p * out_itemsize  # output tiles
                + tm_ * dout_p * 4                 # f32 accumulator scratch
                + h_bytes)

    # Shrink tiles (multiples of 128) until the working set fits the budget.
    while est(tm, tk) > budget and (tm > 128 or tk > 128):
        if tk >= tm and tk > 128:
            tk = max(128, (tk // 2) // 128 * 128)
        else:
            tm = max(128, (tm // 2) // 128 * 128)

    n_rows_p = _round_up(n, tm)            # rows of adj / out
    n_k_p = _round_up(n, tk)               # contraction axis (cols of adj)

    # Stage 1 once, outside the kernel (removes the per-row-tile x re-stream).
    h = jnp.dot(x.astype(compute_dtype), weight.astype(compute_dtype),
                preferred_element_type=jnp.float32).astype(compute_dtype)
    h_c = jnp.pad(h, ((0, n_k_p - n), (0, dout_p - dout)))
    adj_c = jnp.pad(adj.astype(compute_dtype),
                    ((0, n_rows_p - n), (0, n_k_p - n)))

    grid = (n_rows_p // tm, n_k_p // tk)

    if h_resident:
        kernel = functools.partial(_gcn_resident_h_kernel, tk=tk)
        h_spec = pl.BlockSpec((n_k_p, dout_p), lambda i, k: (0, 0))
    else:
        kernel = _gcn_streamed_h_kernel
        h_spec = pl.BlockSpec((tk, dout_p), lambda i, k: (k, 0))

    vmem_limit = int(min(cap, max(est(tm, tk) + (8 << 20), 32 << 20)))

    out_p = pl.pallas_call(
        kernel,
        out_shape=jax.ShapeDtypeStruct((n_rows_p, dout_p), out_dtype),
        grid_spec=pltpu.PrefetchScalarGridSpec(
            num_scalar_prefetch=0,
            grid=grid,
            in_specs=[
                h_spec,                                        # h (resident/streamed)
                pl.BlockSpec((tm, tk), lambda i, k: (i, k)),   # adj tile stream
            ],
            out_specs=pl.BlockSpec((tm, dout_p), lambda i, k: (i, 0)),
            scratch_shapes=[pltpu.VMEM((tm, dout_p), jnp.float32)],
        ),
        compiler_params=pltpu.CompilerParams(
            dimension_semantics=("parallel", "arbitrary"),
            vmem_limit_bytes=vmem_limit,
        ),
    )(h_c, adj_c)

    return out_p[:n, :dout]


def glorot_init(key, input_dim, output_dim):
    # Same as the PyTorch glorot_init: U(-r, r), r = sqrt(6 / (in + out)).
    init_range = np.sqrt(6.0 / (input_dim + output_dim))
    return jax.random.uniform(
        key, (input_dim, output_dim), dtype=jnp.float32,
        minval=-init_range, maxval=init_range,
    )


if __name__ == "__main__":
    # Small synthetic GCN layer: N=320 nodes, Din=48, Dout=32.
    N, DIN, DOUT = 320, 48, 32

    key = jax.random.PRNGKey(0)
    k_w, k_x, k_a = jax.random.split(key, 3)

    weight = glorot_init(k_w, DIN, DOUT)                        # (Din, Dout)
    x = jax.random.normal(k_x, (N, DIN), dtype=jnp.float32)     # node features
    # Dense (normalized-ish) adjacency stand-in for the sparse adj buffer.
    adj = jax.random.uniform(k_a, (N, N), dtype=jnp.float32) / N

    # Reference with matching bf16 compute precision and f32 accumulation.
    xb, ab, wb = (v.astype(jnp.bfloat16) for v in (x, adj, weight))
    h_ref = jnp.dot(xb, wb, preferred_element_type=jnp.float32).astype(jnp.bfloat16)
    ref = np.asarray(
        jnp.maximum(jnp.dot(ab, h_ref, preferred_element_type=jnp.float32), 0.0)
    )

    configs = (
        dict(tm=128, tk=128),                    # resident h + k-accumulation + ds slicing
        dict(tm=128, tk=128, h_resident=False),  # streamed-h fallback path
        dict(),                                  # auto tile / residency selection
    )
    for cfg in configs:
        out = graph_conv_sparse(x, adj, weight, **cfg)
        jax.block_until_ready(out)
        np.testing.assert_allclose(np.asarray(out), ref, rtol=5e-3, atol=5e-3)

    print("KERNEL_OK")
</pallas_src>

<mosaic_0001>
module attributes {stable_mosaic.version = 11 : i64} {
  func.func @_gcn_resident_h_kernel(%arg0: i32, %arg1: i32, %arg2: memref<384x128xbf16, #tpu.memory_space<vmem>>, %arg3: memref<128x128xbf16, #tpu.memory_space<vmem>>, %arg4: memref<128x128xf32, #tpu.memory_space<vmem>>, %arg5: memref<128x128xf32, #tpu.memory_space<vmem>>) attributes {dimension_semantics = [#tpu.dimension_semantics<parallel>, #tpu.dimension_semantics<arbitrary>], iteration_bounds = array<i64: 3, 3>, scalar_prefetch = 0 : i64, scratch_operands = 1 : i64, tpu.core_type = #tpu.core_type<tc>, window_params = [{pipeline_mode = #tpu.pipeline_mode<synchronous>, transform_indices = @transform_0, window_bounds = array<i64: 384, 128>}, {transform_indices = @transform_1, window_bounds = array<i64: 128, 128>}, {transform_indices = @transform_2, window_bounds = array<i64: 128, 128>}]} {
    %c0_i32 = arith.constant 0 : i32
    %0 = arith.cmpi eq, %arg1, %c0_i32 : i32
    %1 = arith.extui %0 : i1 to i32
    %c0_i32_0 = arith.constant 0 : i32
    %2 = arith.cmpi ne, %1, %c0_i32_0 : i32
    scf.if %2 {
      %cst_8 = arith.constant 0.000000e+00 : f32
      %15 = vector.broadcast %cst_8 : f32 to vector<128x128xf32>
      %c0_9 = arith.constant 0 : index
      %c0_10 = arith.constant 0 : index
      %16 = vector.load %arg5[%c0_9, %c0_10] : memref<128x128xf32, #tpu.memory_space<vmem>>, vector<128x128xf32>
      tpu.vector_store %arg5[%c0_9, %c0_10], %15 {strides = array<i32>} : memref<128x128xf32, #tpu.memory_space<vmem>>, vector<128x128xf32>,
    } else {
    }
    %c128_i32 = arith.constant 128 : i32
    %3 = arith.muli %arg1, %c128_i32 : i32
    %4 = tpu.assume_multiple %3, 128 : i32
    %c0 = arith.constant 0 : index
    %c0_1 = arith.constant 0 : index
    %5 = vector.load %arg5[%c0, %c0_1] : memref<128x128xf32, #tpu.memory_space<vmem>>, vector<128x128xf32>
    %c0_2 = arith.constant 0 : index
    %c0_3 = arith.constant 0 : index
    %6 = vector.load %arg3[%c0_2, %c0_3] : memref<128x128xbf16, #tpu.memory_space<vmem>>, vector<128x128xbf16>
    %7 = arith.index_cast %4 : i32 to index
    %c0_4 = arith.constant 0 : index
    %8 = vector.load %arg2[%7, %c0_4] : memref<384x128xbf16, #tpu.memory_space<vmem>>, vector<128x128xbf16>
    %cst = arith.constant dense<0.000000e+00> : vector<128x128xf32>
    %9 = tpu.matmul %6, %8, %cst {dimension_numbers = #tpu.dot_dimension_numbers<[1], [0], [0], [1], [0, 0, 1, 1], [], []>} : vector<128x128xbf16>, vector<128x128xbf16>, vector<128x128xf32> -> vector<128x128xf32>
    %10 = arith.addf %5, %9 : vector<128x128xf32>
    %c0_5 = arith.constant 0 : index
    %c0_6 = arith.constant 0 : index
    %11 = vector.load %arg5[%c0_5, %c0_6] : memref<128x128xf32, #tpu.memory_space<vmem>>, vector<128x128xf32>
    tpu.vector_store %arg5[%c0_5, %c0_6], %10 {strides = array<i32>} : memref<128x128xf32, #tpu.memory_space<vmem>>, vector<128x128xf32>,
    %c2_i32 = arith.constant 2 : i32
    %12 = arith.cmpi eq, %arg1, %c2_i32 : i32
    %13 = arith.extui %12 : i1 to i32
    %c0_i32_7 = arith.constant 0 : i32
    %14 = arith.cmpi ne, %13, %c0_i32_7 : i32
    scf.if %14 {
      %c0_8 = arith.constant 0 : index
      %c0_9 = arith.constant 0 : index
      %15 = vector.load %arg5[%c0_8, %c0_9] : memref<128x128xf32, #tpu.memory_space<vmem>>, vector<128x128xf32>
      %cst_10 = arith.constant 0.000000e+00 : f32
      %16 = vector.broadcast %cst_10 : f32 to vector<128x128xf32>
      %17 = arith.maximumf %15, %16 : vector<128x128xf32>
      %c0_11 = arith.constant 0 : index
      %c0_12 = arith.constant 0 : index
      %18 = vector.load %arg4[%c0_11, %c0_12] : memref<128x128xf32, #tpu.memory_space<vmem>>, vector<128x128xf32>
      tpu.vector_store %arg4[%c0_11, %c0_12], %17 {strides = array<i32>} : memref<128x128xf32, #tpu.memory_space<vmem>>, vector<128x128xf32>,
    } else {
    }
    return
  }
  func.func @transform_0(%arg0: i32, %arg1: i32) -> (i32, i32) {
    %c0_i32 = arith.constant 0 : i32
    %c0_i32_0 = arith.constant 0 : i32
    %c0_i32_1 = arith.constant 0 : i32
    return %c0_i32, %c0_i32_0 : i32, i32
  }
  func.func @transform_1(%arg0: i32, %arg1: i32) -> (i32, i32) {
    %c0_i32 = arith.constant 0 : i32
    return %arg0, %arg1 : i32, i32
  }
  func.func @transform_2(%arg0: i32, %arg1: i32) -> (i32, i32) {
    %c0_i32 = arith.constant 0 : i32
    %c0_i32_0 = arith.constant 0 : i32
    return %arg0, %c0_i32 : i32, i32
  }
}

</mosaic_0001>

<bundles_post_ra>
// kernel: tpu_custom_call.1
= control target key start
LH: loop header
LB: loop body
LE: loop exit
PB: predicated region body
PF: predicated region fallthrough
CT: control target
= control target key end

     0   :  { %s1424_s0 = inlined_call_operand.hbm [shape: bf16[384,128], index: 0, kind: input, shape index: {}]   ;;  %s1425_s1 = inlined_call_operand.hbm [shape: bf16[384,384], index: 1, kind: input, shape index: {}]   ;;  %s1426_s2 = inlined_call_operand.hbm [shape: f32[384,128], index: 2, kind: output, shape index: {}]  }
   0x1   :  { %1439 = sst [smem:[#allocation16_spill]] %s1424_s0 }
   0x2   :  { %7 = vsyncpa [#allocation4], 0 }
   0x3   :  { %8 = vsyncpa [#allocation7], 0 }
   0x4   :  { %10 = vsyncpa [#allocation7 + $0x1], 0 }
   0x5   :  { %11 = vsyncpa [#allocation5], 0 }
   0x6   :  { %13 = vsyncpa [#allocation5 + $0x1], 0  ;;  %s1109_s9 = smov 0   ;;  %s1111_s10 = smov 0  }
   0x7   :  { %s1113_s11 = smov 0   ;;  %s1115_s12 = smov 0  }
   0x8   :  { %s1117_s13 = smov 0   ;;  %s1119_s14 = smov 0  }
   0x9   :  { %s1121_s15 = smov 0   ;;  %s1123_s16 = smov 0  }
   0xa   :  { %s1125_s17 = smov 0   ;;  %s1127_s18 = smov 0  }
   0xb   :  { %s1129_s19 = smov 0  }
   0xc LB: > { %1440 = sst [smem:[#allocation12_spill]] %s1075_s17  ;;  %s660_s20 = sadd.s32 4294967295, %s1083_s19   ;;  %s1083_s19 = sphi %s1129_s19, %s19_s19   ;;  %s1079_s18 = sphi %s1127_s18, %s1475_s18   ;;  %s1075_s17 = sphi %s1125_s17, %s1474_s17   ;;  %s1071_s16 = sphi %s1123_s16, %s1473_s16   ;;  %s1067_s15 = sphi %s1121_s15, %s1464_s15   ;;  %s1063_s14 = sphi %s1119_s14, %s1472_s14   ;;  %s1059_s13 = sphi %s1117_s13, %s1471_s13   ;;  %s1055_s12 = sphi %s1115_s12, %s1470_s12   ;;  %s1051_s11 = sphi %s1113_s11, %s1469_s11   ;;  %s1047_s10 = sphi %s1111_s10, %s1468_s10   ;;  %s1043_s9 = sphi %s1109_s9, %s1467_s9  }
   0xd   : > { %s661_s21 = sadd.s32 4294967294, %s1083_s19   ;;  %p68_p0 = scmp.ne.s32.totalorder %s1063_s14, %s1059_s13 }
   0xe   : > { %p69_p1 = scmp.eq.s32.totalorder %s1083_s19, 0  ;;  %p74_p2 = scmp.ne.s32.totalorder %s1059_s13, %s1055_s12 }
   0xf   : > { %p1169_p3 = scmp.eq.s32.totalorder %s660_s20, 0  ;;  %p97_p5 = scmp.ne.s32.totalorder %s1051_s11, %s1047_s10 }
  0x10   : > { %p1174_p4 = por %p69_p1, %p68_p0  ;;  %p98_p7 = scmp.eq.s32.totalorder %s660_s20, 8 }
  0x11   : > { %s1441_s23 = scalar_select %p1169_p3, 1, 0 }
  0x12   : > { %p1182_p6 = por %p1169_p3, %p74_p2  ;;  %p103_p8 = scmp.ne.s32.totalorder %s1047_s10, %s1043_s9 }
  0x13   : > { %p104_p9 = scmp.eq.s32.totalorder %s661_s21, 8  ;;  %p1188_p10 = por %p98_p7, %p97_p5 }
  0x14   : > { %s1443_s26 = scalar_select %p1182_p6, 1, 0 }
  0x15   : > { %s1444_s27 = scalar_select %p1188_p10, 1, 0 }
  0x16   : > { %p662_p11 = scmp.ge.s32.totalorder %s1083_s19, 1  ;;  %p1193_p12 = por %p104_p9, %p103_p8 }
  0x17   : > { %p111_p13 = scmp.lt.s32.totalorder %s1083_s19, 10  ;;  %s1085_s30 = smov [#allocation3]  }
  0x18   : > { %s1445_s28 = scalar_select %p1193_p12, 1, 0 }
  0x19   : > { %p1198_p0 = pnand %p662_p11, %p111_p13  ;;  %s123_s3 = sshll.u32 %s1085_s30, 4  ;;  %s124_s3 = int_to_ptr.vmem [resolvable:$true] %s123_s3 }
  0x1a   : > { %1446 = sst [smem:[#allocation13_spill]] %s1445_s28  ;;  %p785_p2 = scmp.lt.s32.totalorder %s1083_s19, 9 }
  0x1b   : > { %s1447_s29 = scalar_select %p1198_p0, 1, 0 }
  0x1c   : > { %p772_p1 = pneg %p1198_p0  ;;  %p1213_p7 = pnand %p785_p2, %p1174_p4 }
  0x1d   : > { %s1450_s0 = sld [smem:[#allocation16_spill]] }
  0x1e   : > { %p1207_p5 = pnand %p772_p1, %p1169_p3 }
  0x1f   : > { %s1449_s5 = scalar_select %p1213_p7, 1, 0 }
  0x20   : > { %p901_p9 = pneg %p1207_p5 }
  0x23   : > { %s899_s8 = scalar_lea.hbm %s1450_s0, 3072 }
  0x24   : > { %p900_p8 = scmp.ne.s32.totalorder %s1450_s0, %s899_s8  ;;  %p906_p1 = scmp.lt.u32.totalorder %s899_s8, %s1450_s0 }
  0x26   : > { %p902_p11 = pnand %p901_p9, %p900_p8 }
  0x28   : > { %p903_p13 = pneg %p902_p11 }
  0x2a   : > { %p908_p4 = pnand %p906_p1, %p903_p13 }
  0x2c   : > { %911 = shalt.err (!%p908_p4)
}
  0x2d   : > { %s912_s25 = scalar_lea.vmem %s124_s3, 3072  ;;  %p920_p6 = scmp.lt.s32.totalorder %s124_s3, %s124_s3 }
  0x2e   : > { %p913_p2 = scmp.ne.s32.totalorder %s124_s3, %s912_s25  ;;  %p921_p3 = scmp.lt.s32.totalorder %s912_s25, %s912_s25 }
  0x30   : > { %p915_p12 = pnand %p913_p2, %p901_p9  ;;  %p922_p0 = por %p921_p3, %p920_p6 }
  0x32   : > { %p916_p10 = pneg %p915_p12 }
  0x34   : > { %p923_p7 = pnand %p922_p0, %p916_p10 }
  0x36   : > { %926 = shalt.err (!%p923_p7)
}
  0x37   : > { %s1433_s6 = smov 64   ;;  %s1434_s7 = smov 4  }
  0x38   : > { %775 = dma.hbm_to_vmem [thread:$0]  (!%p1207_p5), %s1450_s0, 3072, %s124_s3, [#allocation4], %s1433_s6, %s1433_s6, %s1434_s7  }
  0x39   : > { %s28_s20 = sadd.s32 1, %s1075_s17  ;;  %s31_s21 = sadd.s32 1, %s1079_s18 }
  0x3a   : > { %p29_p3 = scmp.ge.s32.totalorder %s28_s20, 3  ;;  %s137_s30 = sand.u32 1, %s1063_s14  }
  0x3b   : > { %s665_s25 = sshll.u32 %s137_s30, 6  ;;  %s763_s22 = smul.u32 48, %s1079_s18 }
  0x3c   : > { %s1477_s20 = smov (%p29_p3, %s28_s20), 0  ;;  %s1479_s21 = smov (!%p29_p3, %s31_s21), %s1079_s18 }
  0x3d   : > { %1451 = sst [smem:[#allocation14_spill]] %s1477_s20  ;;  %s57_s4 = ssub.s32 %s1075_s17, %s1477_s20 }
  0x3e   : > { %p33_p6 = scmp.ge.s32.totalorder %s1479_s21, 3  ;;  %s141_s24 = scalar_lea.vmem [#allocation6], %s665_s25 }
  0x3f   : > { %s150_s3 = sshll.u32 %s141_s24, 4  ;;  %s147_s8 = sadd.s32 %s1075_s17, %s763_s22  ;;  %s1248_s3 = int_to_ptr.vmem [resolvable:$true] %s150_s3 }
  0x40   : > { %s1481_s21 = smov (%p33_p6, %s1479_s21), 0  ;;  %s668_s6 = sshll.u32 %s147_s8, 6 }
  0x41   : > { %1452 = sst [smem:[#allocation15_spill]] %s1481_s21  ;;  %s56_s12 = ssub.s32 %s1079_s18, %s1481_s21 }
  0x42   : > { %s58_s7 = sor.u32 %s57_s4, %s56_s12  ;;  %p85_p10 = scmp.eq.s32.totalorder %s56_s12, 0 }
  0x43   : > { %p59_p12 = scmp.eq.s32.totalorder %s58_s7, 0  ;;  %s1255_s20 = scalar_lea.hbm %s1425_s1, %s668_s6 }
  0x44   : > { %s1453_s25 = sadd.s32 1, %s1051_s11  ;;  %s1454_s22 = sadd.s32 1, %s1063_s14 }
  0x45   : > { %s1260_s24 = scalar_select %p85_p10, %s1051_s11, %s1453_s25  }
  0x46   : > { %s1265_s17 = scalar_select %p59_p12, %s1063_s14, %s1454_s22  }
  0x47   : > { %s1267_s21 = scalar_lea.sflag [#allocation7], %s137_s30  ;;  %s927_s4 = scalar_lea.hbm %s1255_s20, 1024 }
  0x48   : > { %p928_p0 = scmp.ne.s32.totalorder %s1255_s20, %s927_s4  ;;  %p1455_p5 = scmp.ne.s32.totalorder %s1449_s5, 0 }
  0x49   : > { %s932_s6 = scalar_lea.hbm %s1425_s1, 9216  ;;  %p933_p11 = scmp.lt.u32.totalorder %s1255_s20, %s1425_s1 }
  0x4a   : > { %p929_p7 = pneg %p1455_p5  ;;  %p934_p13 = scmp.lt.u32.totalorder %s932_s6, %s927_s4 }
  0x4b   : > { %p936_p4 = scmp.lt.u32.totalorder %s927_s4, %s1255_s20 }
  0x4c   : > { %p930_p8 = pnand %p929_p7, %p928_p0  ;;  %p935_p1 = por %p934_p13, %p933_p11 }
  0x4e   : > { %p931_p9 = pneg %p930_p8  ;;  %p937_p2 = por %p936_p4, %p935_p1 }
  0x50   : > { %p938_p3 = pnand %p937_p2, %p931_p9 }
  0x52   : > { %941 = shalt.err (!%p938_p3)
}
  0x53   : > { %s942_s30 = scalar_lea.vmem %s1248_s3, 1024  ;;  %s1088_s12 = smov [#allocation6]  }
  0x54   : > { %p943_p6 = scmp.ne.s32.totalorder %s1248_s3, %s942_s30  ;;  %s947_s25 = sshll.u32 %s1088_s12, 4  ;;  %s948_s25 = int_to_ptr.vmem [resolvable:$false] %s947_s25 }
  0x55   : > { %s949_s22 = scalar_lea.vmem %s948_s25, 2048  ;;  %p950_p0 = scmp.lt.s32.totalorder %s1248_s3, %s948_s25 }
  0x56   : > { %p945_p10 = pnand %p943_p6, %p929_p7  ;;  %p951_p8 = scmp.lt.s32.totalorder %s949_s22, %s942_s30 }
  0x58   : > { %p946_p12 = pneg %p945_p10  ;;  %p952_p11 = por %p951_p8, %p950_p0 }
  0x5a   : > { %p953_p13 = pnand %p952_p11, %p946_p12 }
  0x5c   : > { %956 = shalt.err (!%p953_p13)
}
  0x5d   : > { %s1089_s4 = smov 192   ;;  %s1456_s0 = smov 4  }
  0x5e   : > { %s1457_s28 = smov 64   ;;  %p1458_p7 = scmp.ne.s32.totalorder %s1447_s29, 0 }
  0x5f   : > { %779 = dma.hbm_to_vmem [thread:$0]  (!%p1455_p5), %s1255_s20, 1024, %s1248_s3, %s1267_s21, %s1089_s4, %s1457_s28, %s1456_s0  }
  0x60   : > { %162 = sbr.rel (%p1458_p7) target bundleno = 418 (0x1a2), region = 28  ;;  %p1459_p9 = scmp.ne.s32.totalorder (!%p1458_p7), %s1441_s23, 0 }
  0x67   : > { %1030 = dma.done.wait (%p1459_p9), [#allocation4], 3072  }
  0x68   : > { %1032 = vsyncadd (%p1459_p9), [#allocation4], 4294964224  ;;  %s168_s6 = sand.u32 1, %s1059_s13   ;;  %p1460_p1 = scmp.ne.s32.totalorder %s1443_s26, 0 }
  0x69   : > { %s671_s7 = sshll.u32 %s168_s6, 6  ;;  %s169_s5 = scalar_lea.sflag [#allocation7], %s168_s6 }
  0x6a   : > { %s1304_s8 = scalar_lea.vmem [#allocation6], %s671_s7 }
  0x6b   : > { %1034 = dma.done.wait (%p1460_p1), %s169_s5, 1024  }
  0x6c   : > { %1036 = vsyncadd (%p1460_p1), %s169_s5, 4294966272  ;;  %s190_s29 = sand.u32 1, %s1047_s10   ;;  %p673_p5 = scmp.ne.s32.totalorder %s1067_s15, 0 }
  0x6d   : > { %s672_s20 = sshll.u32 %s190_s29, 7  ;;  %v1090_v0 = vmov (!%p673_p5), 0.0  }
  0x6e   : > { %s1313_s21 = scalar_lea.vmem [#allocation8], %s672_s20  ;;  %199 = sbr.rel (%p673_p5) target bundleno = 118 (0x76), region = 40  ;;  %200 = vst [vmem:[#allocation2] sm:$0xff] (!%p673_p5), %v1090_v0  ;;  %201 = vst [vmem:[#allocation2 + $0x8] sm:$0xff] (!%p673_p5), %v1090_v0 }
  0x6f   : > { %202 = vst [vmem:[#allocation2 + $0x10] sm:$0xff] (!%p673_p5), %v1090_v0  ;;  %203 = vst [vmem:[#allocation2 + $0x18] sm:$0xff] (!%p673_p5), %v1090_v0 }
  0x70   : > { %204 = vst [vmem:[#allocation2 + $0x20] sm:$0xff] (!%p673_p5), %v1090_v0  ;;  %205 = vst [vmem:[#allocation2 + $0x28] sm:$0xff] (!%p673_p5), %v1090_v0 }
  0x71   : > { %206 = vst [vmem:[#allocation2 + $0x30] sm:$0xff] (!%p673_p5), %v1090_v0  ;;  %207 = vst [vmem:[#allocation2 + $0x38] sm:$0xff] (!%p673_p5), %v1090_v0 }
  0x72   : > { %208 = vst [vmem:[#allocation2 + $0x40] sm:$0xff] (!%p673_p5), %v1090_v0  ;;  %209 = vst [vmem:[#allocation2 + $0x48] sm:$0xff] (!%p673_p5), %v1090_v0 }
  0x73   : > { %210 = vst [vmem:[#allocation2 + $0x50] sm:$0xff] (!%p673_p5), %v1090_v0  ;;  %211 = vst [vmem:[#allocation2 + $0x58] sm:$0xff] (!%p673_p5), %v1090_v0 }
  0x74   : > { %212 = vst [vmem:[#allocation2 + $0x60] sm:$0xff] (!%p673_p5), %v1090_v0  ;;  %213 = vst [vmem:[#allocation2 + $0x68] sm:$0xff] (!%p673_p5), %v1090_v0 }
  0x75   : > { %214 = vst [vmem:[#allocation2 + $0x70] sm:$0xff] %v1090_v0  ;;  %215 = vst [vmem:[#allocation2 + $0x78] sm:$0xff] %v1090_v0 }
  0x76 PF: > { %s674_s23 = sshll.u32 %s1067_s15, 7  ;;  %v891_v1 = vld [vmem:[%s1304_s8] sm:$0xff]   ;;  %v893_v11 = vld [vmem:[%s1304_s8 + $0x8] sm:$0xff]   ;;  %v895_v13 = vld [vmem:[%s1304_s8 + $0x10] sm:$0xff]   ;;  %p692_p4 = scmp.ne.s32.totalorder %s1067_s15, 2 }
  0x77   : > { %s249_s26 = sshra.s32 %s674_s23, 3  ;;  %v892_v2 = vld [vmem:[%s1304_s8 + $0x20] sm:$0xff]   ;;  %731 = vmatprep.mubr.bf16.mxu0 %v891_v1  ;;  %v894_v12 = vld [vmem:[%s1304_s8 + $0x28] sm:$0xff]   ;;  %v896_v14 = vld [vmem:[%s1304_s8 + $0x30] sm:$0xff]  }
  0x78   : > { %s675_s3 = sshll.u32 %s249_s26, 2  ;;  %739 = vmatprep.mubr.bf16.mxu1 %v892_v2  ;;  %v897_v15 = vld [vmem:[%s1304_s8 + $0x18] sm:$0xff]   ;;  %v219_v17 = vld [vmem:[#allocation2 + $0x10] sm:$0xff]  ;;  %v217_v19 = vld [vmem:[#allocation2] sm:$0xff] }
  0x79   : > { %s1319_s30 = scalar_lea.vmem [#allocation3], %s675_s3  ;;  %v898_v16 = vld [vmem:[%s1304_s8 + $0x38] sm:$0xff]   ;;  %v218_v29 = vld [vmem:[#allocation2 + $0x8] sm:$0xff]  ;;  %v223_v41 = vld [vmem:[#allocation2 + $0x30] sm:$0xff] }
  0x7a   : > { %v883_v3 = vld [vmem:[%s1319_s30] sm:$0xff]   ;;  %v884_v4 = vld [vmem:[%s1319_s30 + $0x8] sm:$0xff]   ;;  %v885_v5 = vld [vmem:[%s1319_s30 + $0x10] sm:$0xff]  }
  0x7b   : > { %715 = vmatprep.subr.bf16.mxu0 %v883_v3  ;;  %747 = vmatprep.subr.bf16.mxu1 %v883_v3  ;;  %v886_v6 = vld [vmem:[%s1319_s30 + $0x18] sm:$0xff]   ;;  %v887_v7 = vld [vmem:[%s1319_s30 + $0x20] sm:$0xff]   ;;  %v888_v8 = vld [vmem:[%s1319_s30 + $0x28] sm:$0xff]  }
  0x7c   : > { %716 = vmatpush3.bf16.msra.mxu0 %v883_v3  ;;  %755 = vmatpush3.bf16.msra.mxu1 %v883_v3  ;;  %v889_v9 = vld [vmem:[%s1319_s30 + $0x30] sm:$0xff]   ;;  %v890_v10 = vld [vmem:[%s1319_s30 + $0x38] sm:$0xff]   ;;  %v225_v20 = vld [vmem:[#allocation2 + $0x40] sm:$0xff] }
  0x7d   : > { %717 = vmatprep.subr.bf16.mxu0 %v884_v4  ;;  %748 = vmatprep.subr.bf16.mxu1 %v884_v4  ;;  %v227_v18 = vld [vmem:[#allocation2 + $0x50] sm:$0xff]  ;;  %v220_v23 = vld [vmem:[#allocation2 + $0x18] sm:$0xff]  ;;  %v226_v30 = vld [vmem:[#allocation2 + $0x48] sm:$0xff] }
  0x7e   : > { %v228_v24 = vld [vmem:[#allocation2 + $0x58] sm:$0xff]  ;;  %v231_v42 = vld [vmem:[#allocation2 + $0x70] sm:$0xff]  ;;  %v221_v43 = vld [vmem:[#allocation2 + $0x20] sm:$0xff] }
  0x7f   : > { %v229_v44 = vld [vmem:[#allocation2 + $0x60] sm:$0xff]  ;;  %v224_v47 = vld [vmem:[#allocation2 + $0x38] sm:$0xff]  ;;  %v222_v53 = vld [vmem:[#allocation2 + $0x28] sm:$0xff] }
  0x80   : > { %718 = vmatpush3.bf16.msra.mxu0 %v884_v4  ;;  %756 = vmatpush3.bf16.msra.mxu1 %v884_v4  ;;  %v232_v48 = vld [vmem:[#allocation2 + $0x78] sm:$0xff]  ;;  %v230_v54 = vld [vmem:[#allocation2 + $0x68] sm:$0xff] }
  0x81   : > { %719 = vmatprep.subr.bf16.mxu0 %v885_v5  ;;  %749 = vmatprep.subr.bf16.mxu1 %v885_v5 }
  0x84   : > { %720 = vmatpush3.bf16.msra.mxu0 %v885_v5  ;;  %757 = vmatpush3.bf16.msra.mxu1 %v885_v5 }
  0x85   : > { %721 = vmatprep.subr.bf16.mxu0 %v886_v6  ;;  %750 = vmatprep.subr.bf16.mxu1 %v886_v6 }
  0x88   : > { %722 = vmatpush3.bf16.msra.mxu0 %v886_v6  ;;  %758 = vmatpush3.bf16.msra.mxu1 %v886_v6 }
  0x89   : > { %723 = vmatprep.subr.bf16.mxu0 %v887_v7  ;;  %751 = vmatprep.subr.bf16.mxu1 %v887_v7 }
  0x8c   : > { %724 = vmatpush3.bf16.msra.mxu0 %v887_v7  ;;  %759 = vmatpush3.bf16.msra.mxu1 %v887_v7 }
  0x8d   : > { %725 = vmatprep.subr.bf16.mxu0 %v888_v8  ;;  %752 = vmatprep.subr.bf16.mxu1 %v888_v8 }
  0x90   : > { %726 = vmatpush3.bf16.msra.mxu0 %v888_v8  ;;  %760 = vmatpush3.bf16.msra.mxu1 %v888_v8 }
  0x91   : > { %727 = vmatprep.subr.bf16.mxu0 %v889_v9  ;;  %753 = vmatprep.subr.bf16.mxu1 %v889_v9 }
  0x94   : > { %728 = vmatpush3.bf16.msra.mxu0 %v889_v9  ;;  %761 = vmatpush3.bf16.msra.mxu1 %v889_v9 }
  0x95   : > { %729 = vmatprep.subr.bf16.mxu0 %v890_v10  ;;  %754 = vmatprep.subr.bf16.mxu1 %v890_v10 }
  0x98   : > { %730 = vmatpush3.bf16.msra.mxu0 %v890_v10  ;;  %762 = vmatpush3.bf16.msra.mxu1 %v890_v10 }
  0x9b   : > { %732 = vmatmul.mubr.bf16.vlgmr.msra.gmra.mrb[0].mxu0 %v893_v11  ;;  %740 = vmatmul.mubr.bf16.vlgmr.msra.gmra.mrb[0].mxu1 %v894_v12 }
  0x9c   : > { %735 = vmatprep.mubr.bf16.mxu0 %v895_v13  ;;  %743 = vmatprep.mubr.bf16.mxu1 %v896_v14 }
  0xa3   : > { %736 = vmatmul.mubr.bf16.gmra.mrb[4].mxu0 %v897_v15  ;;  %744 = vmatmul.mubr.bf16.gmra.mrb[4].mxu1 %v898_v16 }
 0x16e   : > { %v733_v21 = vpop.f32.mrb[0].mxu0  ;;  %v741_v22 = vpop.f32.mrb[0].mxu1 }
 0x16f   : > { %v464_v25 = vadd.f32 %v733_v21, %v219_v17  ;;  %v472_v26 = vadd.f32 %v741_v22, %v227_v18  ;;  %v399_v27 = vpop.f32.mrb[1].mxu0  ;;  %v431_v28 = vpop.f32.mrb[1].mxu1 }
 0x170   : > { %v462_v31 = vadd.f32 %v399_v27, %v217_v19  ;;  %v470_v32 = vadd.f32 %v431_v28, %v225_v20  ;;  %v734_v33 = vpop.f32.mrb[2].mxu0  ;;  %v742_v34 = vpop.f32.mrb[2].mxu1 }
 0x171   : > { %480 = vst [vmem:[#allocation2 + $0x10] sm:$0xff] %v464_v25  ;;  %488 = vst [vmem:[#allocation2 + $0x50] sm:$0xff] %v472_v26  ;;  %v465_v35 = vadd.f32 %v734_v33, %v220_v23  ;;  %v473_v36 = vadd.f32 %v742_v34, %v228_v24  ;;  %v402_v37 = vpop.f32.mrb[3].mxu0  ;;  %v434_v38 = vpop.f32.mrb[3].mxu1 }
 0x172   : > { %478 = vst [vmem:[#allocation2] sm:$0xff] %v462_v31  ;;  %486 = vst [vmem:[#allocation2 + $0x40] sm:$0xff] %v470_v32  ;;  %v463_v39 = vadd.f32 %v402_v37, %v218_v29  ;;  %v471_v40 = vadd.f32 %v434_v38, %v226_v30 }
 0x173   : > { %481 = vst [vmem:[#allocation2 + $0x18] sm:$0xff] %v465_v35  ;;  %489 = vst [vmem:[#allocation2 + $0x58] sm:$0xff] %v473_v36 }
 0x174   : > { %479 = vst [vmem:[#allocation2 + $0x8] sm:$0xff] %v463_v39  ;;  %487 = vst [vmem:[#allocation2 + $0x48] sm:$0xff] %v471_v40 }
 0x176   : > { %v737_v45 = vpop.f32.mrb[4].mxu0  ;;  %v745_v46 = vpop.f32.mrb[4].mxu1  ;;  %497 = sbr.rel (%p692_p4) target bundleno = 392 (0x188), region = 44 }
 0x177   : > { %v468_v49 = vadd.f32 %v737_v45, %v223_v41  ;;  %v476_v50 = vadd.f32 %v745_v46, %v231_v42  ;;  %v415_v51 = vpop.f32.mrb[5].mxu0  ;;  %v447_v52 = vpop.f32.mrb[5].mxu1 }
 0x178   : > { %v466_v55 = vadd.f32 %v415_v51, %v221_v43  ;;  %v474_v56 = vadd.f32 %v447_v52, %v229_v44  ;;  %v738_v57 = vpop.f32.mrb[6].mxu0  ;;  %v746_v58 = vpop.f32.mrb[6].mxu1  ;;  %v500_v3 = vld [vmem:[#allocation2 + $0x10] sm:$0xff] (!%p692_p4) }
 0x179   : > { %484 = vst [vmem:[#allocation2 + $0x30] sm:$0xff] %v468_v49  ;;  %492 = vst [vmem:[#allocation2 + $0x70] sm:$0xff] %v476_v50  ;;  %v469_v59 = vadd.f32 %v738_v57, %v224_v47  ;;  %v477_v60 = vadd.f32 %v746_v58, %v232_v48  ;;  %v418_v61 = vpop.f32.mrb[7].mxu0  ;;  %v450_v62 = vpop.f32.mrb[7].mxu1  ;;  %v498_v1 = vld [vmem:[#allocation2] sm:$0xff] (!%p692_p4)  ;;  %v516_v6 = vmax.f32 (!%p692_p4), %v500_v3, 0.0 }
 0x17a   : > { %482 = vst [vmem:[#allocation2 + $0x20] sm:$0xff] %v466_v55  ;;  %490 = vst [vmem:[#allocation2 + $0x60] sm:$0xff] %v474_v56  ;;  %v467_v63 = vadd.f32 %v418_v61, %v222_v53  ;;  %v475_v0 = vadd.f32 %v450_v62, %v230_v54  ;;  %v514_v4 = vmax.f32 (!%p692_p4), %v498_v1, 0.0  ;;  %v501_v7 = vld [vmem:[#allocation2 + $0x18] sm:$0xff] (!%p692_p4)  ;;  %v506_v15 = vld [vmem:[#allocation2 + $0x40] sm:$0xff] (!%p692_p4) }
 0x17b   : > { %485 = vst [vmem:[#allocation2 + $0x38] sm:$0xff] %v469_v59  ;;  %493 = vst [vmem:[#allocation2 + $0x78] sm:$0xff] %v477_v60  ;;  %v499_v2 = vld [vmem:[#allocation2 + $0x8] sm:$0xff] (!%p692_p4)  ;;  %v517_v10 = vmax.f32 (!%p692_p4), %v501_v7, 0.0  ;;  %v522_v18 = vmax.f32 (!%p692_p4), %v506_v15, 0.0  ;;  %v508_v20 = vld [vmem:[#allocation2 + $0x50] sm:$0xff] (!%p692_p4) }
 0x17c   : > { %483 = vst [vmem:[#allocation2 + $0x28] sm:$0xff] %v467_v63  ;;  %491 = vst [vmem:[#allocation2 + $0x68] sm:$0xff] %v475_v0  ;;  %v515_v5 = vmax.f32 (!%p692_p4), %v499_v2, 0.0  ;;  %v507_v19 = vld [vmem:[#allocation2 + $0x48] sm:$0xff] (!%p692_p4)  ;;  %v509_v21 = vld [vmem:[#allocation2 + $0x58] sm:$0xff] (!%p692_p4)  ;;  %v524_v23 = vmax.f32 (!%p692_p4), %v508_v20, 0.0 }
 0x17d   : > { %530 = vst [vmem:[%s1313_s21] sm:$0xff] %v514_v4  ;;  %532 = vst [vmem:[%s1313_s21 + $0x10] sm:$0xff] %v516_v6  ;;  %v523_v22 = vmax.f32 %v507_v19, 0.0  ;;  %v525_v24 = vmax.f32 %v509_v21, 0.0 }
 0x17e   : > { %531 = vst [vmem:[%s1313_s21 + $0x8] sm:$0xff] %v515_v5  ;;  %533 = vst [vmem:[%s1313_s21 + $0x18] sm:$0xff] %v517_v10 }
 0x17f   : > { %538 = vst [vmem:[%s1313_s21 + $0x40] sm:$0xff] %v522_v18  ;;  %539 = vst [vmem:[%s1313_s21 + $0x48] sm:$0xff] %v523_v22 }
 0x180   : > { %v504_v13 = vld [vmem:[#allocation2 + $0x30] sm:$0xff]  ;;  %540 = vst [vmem:[%s1313_s21 + $0x50] sm:$0xff] %v524_v23  ;;  %541 = vst [vmem:[%s1313_s21 + $0x58] sm:$0xff] %v525_v24 }
 0x181   : > { %v502_v8 = vld [vmem:[#allocation2 + $0x20] sm:$0xff]  ;;  %v520_v16 = vmax.f32 %v504_v13, 0.0  ;;  %v512_v27 = vld [vmem:[#allocation2 + $0x70] sm:$0xff] }
 0x182   : > { %v518_v11 = vmax.f32 %v502_v8, 0.0  ;;  %v505_v14 = vld [vmem:[#allocation2 + $0x38] sm:$0xff]  ;;  %v510_v25 = vld [vmem:[#allocation2 + $0x60] sm:$0xff]  ;;  %v528_v30 = vmax.f32 %v512_v27, 0.0 }
 0x183   : > { %v503_v9 = vld [vmem:[#allocation2 + $0x28] sm:$0xff]  ;;  %v521_v17 = vmax.f32 %v505_v14, 0.0  ;;  %536 = vst [vmem:[%s1313_s21 + $0x30] sm:$0xff] %v520_v16  ;;  %v526_v28 = vmax.f32 %v510_v25, 0.0  ;;  %v513_v31 = vld [vmem:[#allocation2 + $0x78] sm:$0xff] }
 0x184   : > { %v519_v12 = vmax.f32 %v503_v9, 0.0  ;;  %534 = vst [vmem:[%s1313_s21 + $0x20] sm:$0xff] %v518_v11  ;;  %v511_v26 = vld [vmem:[#allocation2 + $0x68] sm:$0xff]  ;;  %v529_v32 = vmax.f32 %v513_v31, 0.0  ;;  %544 = vst [vmem:[%s1313_s21 + $0x70] sm:$0xff] %v528_v30 }
 0x185   : > { %537 = vst [vmem:[%s1313_s21 + $0x38] sm:$0xff] %v521_v17  ;;  %v527_v29 = vmax.f32 %v511_v26, 0.0  ;;  %542 = vst [vmem:[%s1313_s21 + $0x60] sm:$0xff] %v526_v28 }
 0x186   : > { %535 = vst [vmem:[%s1313_s21 + $0x28] sm:$0xff] %v519_v12  ;;  %545 = vst [vmem:[%s1313_s21 + $0x78] sm:$0xff] %v529_v32 }
 0x187   : > { %543 = vst [vmem:[%s1313_s21 + $0x68] sm:$0xff] %v527_v29 }
 0x188 PF: > { %s698_s15 = sshll.u32 %s1071_s16, 11  ;;  %s560_s4 = sshll.u32 %s1313_s21, 4  ;;  %s1359_s4 = int_to_ptr.vmem [resolvable:$true] %s560_s4 }
 0x189   : > { %s1356_s22 = scalar_lea.hbm %s1426_s2, %s698_s15  ;;  %s1363_s0 = scalar_lea.sflag [#allocation5], %s190_s29 }
 0x18a   : > { %s957_s28 = scalar_lea.vmem %s1359_s4, 2048  ;;  %p1461_p3 = scmp.ne.s32.totalorder %s1444_s27, 0 }
 0x18b   : > { %p958_p2 = scmp.ne.s32.totalorder %s1359_s4, %s957_s28  ;;  %s1091_s16 = smov [#allocation8]  }
 0x18c   : > { %s961_s6 = sshll.u32 %s1091_s16, 4  ;;  %s962_s6 = int_to_ptr.vmem [resolvable:$false] %s961_s6 }
 0x18d   : > { %p959_p6 = pnand %p958_p2, %p1461_p3  ;;  %s963_s7 = scalar_lea.vmem %s962_s6, 4096 }
 0x18e   : > { %p964_p12 = scmp.lt.s32.totalorder %s1359_s4, %s962_s6  ;;  %p965_p0 = scmp.lt.s32.totalorder %s963_s7, %s957_s28 }
 0x18f   : > { %p960_p10 = pneg %p959_p6 }
 0x190   : > { %p966_p8 = por %p965_p0, %p964_p12 }
 0x192   : > { %p967_p11 = pnand %p966_p8, %p960_p10 }
 0x194   : > { %970 = shalt.err (!%p967_p11)
}
 0x195   : > { %s971_s5 = scalar_lea.hbm %s1356_s22, 2048  ;;  %s975_s20 = scalar_lea.hbm %s1426_s2, 6144 }
 0x196   : > { %p972_p13 = scmp.ne.s32.totalorder %s1356_s22, %s971_s5  ;;  %p976_p1 = scmp.lt.u32.totalorder %s1356_s22, %s1426_s2 }
 0x197   : > { %p977_p5 = scmp.lt.u32.totalorder %s975_s20, %s971_s5  ;;  %p979_p2 = scmp.lt.u32.totalorder %s971_s5, %s1356_s22 }
 0x198   : > { %p973_p7 = pnand %p972_p13, %p1461_p3 }
 0x199   : > { %p978_p4 = por %p977_p5, %p976_p1 }
 0x19a   : > { %p974_p9 = pneg %p973_p7 }
 0x19b   : > { %p980_p6 = por %p979_p2, %p978_p4 }
 0x19d   : > { %p981_p10 = pnand %p980_p6, %p974_p9 }
 0x19f   : > { %984 = shalt.err (!%p981_p10)
}
 0x1a0   : > { %s1092_s26 = smov 128   ;;  %s1093_s3 = smov 8  }
 0x1a1   : > { %770 = dma.vmem_to_hbm [thread:$0]  (%p1461_p3), %s1359_s4, 2048, %s1356_s22, %s1363_s0, %s1092_s26, %s1092_s26, %s1093_s3  }
 0x1a2 PF: > { %s1462_s30 = sld [smem:[#allocation13_spill]]  ;;  %p787_p12 = scmp.ge.s32.totalorder %s1083_s19, 2 }
 0x1a3   : > { %s575_s15 = sand.u32 1, %s1043_s9  }
 0x1a4   : > { %s576_s12 = scalar_lea.sflag [#allocation5], %s575_s15 }
 0x1a8   : > { %p1463_p0 = scmp.ne.s32.totalorder %s1462_s30, 0 }
 0x1aa   : > { %p781_p8 = pnand %p787_p12, %p1463_p0 }
 0x1ac   : > { %1038 = dma.done.wait (!%p781_p8), %s576_s12, 2048  }
 0x1ad   : > { %1040 = vsyncadd (!%p781_p8), %s576_s12, 4294965248  ;;  %s19_s19 = sadd.s32 1, %s1083_s19   ;;  %s1464_s15 = sld [smem:[#allocation12_spill]] }
 0x1ae   : > { %p16_p11 = scmp.ge.s32.totalorder %s19_s19, 11   ;;  %s1465_s27 = sld [smem:[#allocation14_spill]] }
 0x1af   : > { %s1466_s25 = sld [smem:[#allocation15_spill]]  ;;  %s1467_s9 = smov %s1047_s10 }
 0x1b0   : > { %s1468_s10 = smov %s1051_s11  ;;  %s1469_s11 = smov %s1260_s24 }
 0x1b1   : > { %s1470_s12 = smov %s1059_s13  ;;  %s1471_s13 = smov %s1063_s14 }
 0x1b2   : > { %s1472_s14 = smov %s1265_s17  ;;  %s1473_s16 = smov %s1079_s18 }
 0x1b3   :  { %18 = sbr.rel (!%p16_p11) target bundleno = 12 (0xc), region = 87 }
 0x1b4   : > { %s1474_s17 = smov %s1465_s27 }
 0x1b5   : > { %s1475_s18 = smov %s1466_s25 }
 0x1ba   :  { %581 = vsyncpa [#allocation4], 1 }
 0x1bb   :  { %583 = vsyncpa [#allocation4 + $0x1], 1 }
 0x1bc   :  { %584 = vsyncpa [#allocation7], 1 }
 0x1bd   :  { %586 = vsyncpa [#allocation7 + $0x1], 1 }
 0x1be   :  { %587 = vsyncpa [#allocation5], 1 }
 0x1bf   :  { %589 = vsyncpa [#allocation5 + $0x1], 1 }

</bundles_post_ra>
